<compile_context>
chip_gen: v5e
topology: v5e:2x2
jax: 0.10.0
libtpu: 0.0.40
codegen_flags: <defaults>
</compile_context>

<pallas_src>
import functools

import jax
import jax.numpy as jnp
from jax import lax
from jax.experimental import pallas as pl
from jax.experimental.pallas import tpu as pltpu


def _round_up(x, m):
    return ((x + m - 1) // m) * m


def _cdiv(a, b):
    return (a + b - 1) // b


def _vmem_capacity_bytes():
    """Physical VMEM per TensorCore (128 MiB v5e/v6e, 64 MiB v7x)."""
    try:
        return int(pltpu.get_tpu_info().vmem_capacity_bytes)
    except Exception:
        return 64 * 1024 * 1024  # conservative fallback (v7x)


def _linear_fused_kernel(x_ref, w_ref, b_ref, o_ref, *, compute_dtype):
    """num_k == 1 path: o = x @ w + bias, no scratch accumulator round-trip."""
    xv = x_ref[...]
    if compute_dtype is not None:
        xv = xv.astype(compute_dtype)
    d = lax.dot_general(
        xv, w_ref[...],
        dimension_numbers=(((1,), (0,)), ((), ())),
        preferred_element_type=jnp.float32)
    o_ref[...] = (d + b_ref[...].astype(jnp.float32)).astype(o_ref.dtype)


def _linear_ksplit_kernel(x_ref, w_ref, b_ref, o_ref, acc_ref, *, compute_dtype):
    """K-split path: f32 scratch accumulator, bias folded into k == 0 init,
    fused epilogue (last-k partial written straight to the output)."""
    k = pl.program_id(2)
    last = pl.num_programs(2) - 1

    xv = x_ref[...]
    if compute_dtype is not None:
        xv = xv.astype(compute_dtype)
    d = lax.dot_general(
        xv, w_ref[...],
        dimension_numbers=(((1,), (0,)), ((), ())),
        preferred_element_type=jnp.float32)

    @pl.when(k == 0)
    def _():
        acc_ref[...] = jnp.broadcast_to(
            b_ref[...].astype(jnp.float32), acc_ref.shape)

    partial = acc_ref[...] + d

    @pl.when(k != last)
    def _():
        acc_ref[...] = partial

    @pl.when(k == last)
    def _():
        o_ref[...] = partial.astype(o_ref.dtype)


def linear_classifier(x, weight, bias, *, compute_dtype=None,
                      vmem_budget_bytes=None):
    """y = x @ weight.T + bias, matching torch.nn.Linear.

    x:      (B, in_dim)
    weight: (n_classes, in_dim)  -- native PyTorch layout
    bias:   (n_classes,)
    compute_dtype: optional MXU operand dtype (e.g. jnp.bfloat16); x is cast
                   in-kernel, accumulation stays f32, output keeps x.dtype.
    vmem_budget_bytes: optional override of the VMEM tiling budget (testing).
    """
    B, in_dim = x.shape
    n_classes, in_dim_w = weight.shape
    assert in_dim_w == in_dim
    out_dtype = x.dtype

    w_dtype = compute_dtype if compute_dtype is not None else weight.dtype
    x_item = jnp.dtype(x.dtype).itemsize
    w_item = jnp.dtype(w_dtype).itemsize
    o_item = jnp.dtype(out_dtype).itemsize

    # ---- VMEM-footprint-driven tiling ---------------------------------------
    vmem_cap = _vmem_capacity_bytes()
    budget = vmem_budget_bytes if vmem_budget_bytes is not None else vmem_cap // 2
    w_budget = budget // 2  # double-buffered weight slab gets at most half

    n_pad = _round_up(n_classes, 128)

    # Class (N) tiling: keep the whole class axis resident when it fits.
    if 2 * in_dim * n_pad * w_item <= w_budget:
        tn = n_pad
    else:
        tn = 128
        for c in (2048, 1024, 512, 256, 128):
            if c <= n_pad and 2 * in_dim * c * w_item <= w_budget:
                tn = c
                break
    n_pad2 = _round_up(n_pad, tn)
    num_n = n_pad2 // tn

    # K (in_dim) tiling: split only if the (tk, tn) weight tile still overflows.
    tk = in_dim
    if 2 * in_dim * tn * w_item > w_budget:
        for c in (4096, 2048, 1024, 512, 256, 128):
            if in_dim % c == 0 and 2 * c * tn * w_item <= w_budget:
                tk = c
                break
    num_k = in_dim // tk  # tk divides in_dim by construction

    # Batch tiling: divisor-aware (minimal padding); >= 2 tiles when B >= 16 so
    # both v7x TensorCores get work (one extra ~0.35us step on 1-TC chips).
    rem = max(budget - 2 * tk * tn * w_item - 2 * tn * 4, 1 << 20)
    per_row = 2 * tk * x_item + 2 * tn * o_item + (tn * 4 if num_k > 1 else 0)
    tb_cap = max(8, min(2048, (rem // per_row) // 8 * 8))
    num_b = max(1, _cdiv(B, tb_cap))
    if B >= 16:
        num_b = max(num_b, 2)
    tb = _round_up(_cdiv(B, num_b), 8)
    b_pad = num_b * tb

    # ---- one-time parameter prep (small classifier weight) ------------------
    wt = weight.astype(w_dtype).T                       # (in_dim, n_classes)
    if n_pad2 != n_classes:
        wt = jnp.pad(wt, ((0, 0), (0, n_pad2 - n_classes)))
    bias2d = bias.astype(jnp.float32).reshape(1, -1)
    if n_pad2 != n_classes:
        bias2d = jnp.pad(bias2d, ((0, 0), (0, n_pad2 - n_classes)))
    if b_pad != B:
        x = jnp.pad(x, ((0, b_pad - B), (0, 0)))        # x NOT cast here

    grid = (num_b, num_n, num_k)
    in_specs = [
        pl.BlockSpec((tb, tk), lambda i, j, k: (i, k)),   # activations stream
        pl.BlockSpec((tk, tn), lambda i, j, k: (k, j)),   # pre-transposed weight
        pl.BlockSpec((1, tn), lambda i, j, k: (0, j)),    # bias
    ]
    out_spec = pl.BlockSpec((tb, tn), lambda i, j, k: (i, j))

    # Scoped-VMEM limit derived from the actual (double-buffered) footprint.
    footprint = (2 * tb * tk * x_item + 2 * tk * tn * w_item
                 + 2 * tb * tn * o_item + 2 * tn * 4
                 + (tb * tn * 4 if num_k > 1 else 0))
    vmem_limit = int(min(vmem_cap, max(32 << 20, int(footprint * 1.5) + (2 << 20))))

    # Advisory cost estimate with re-fetch multiplicity accounted for.
    x_bytes = b_pad * in_dim * x_item * (num_n if num_k > 1 else 1)
    w_bytes = in_dim * n_pad2 * w_item * (num_b if (num_n > 1 or num_k > 1) else 1)
    cost = pl.CostEstimate(
        flops=2 * b_pad * in_dim * n_pad2,
        transcendentals=0,
        bytes_accessed=int(x_bytes + w_bytes + b_pad * n_pad2 * o_item + n_pad2 * 4),
    )

    if num_k == 1:
        kernel = functools.partial(_linear_fused_kernel, compute_dtype=compute_dtype)
        scratch = []
    else:
        kernel = functools.partial(_linear_ksplit_kernel, compute_dtype=compute_dtype)
        scratch = [pltpu.VMEM((tb, tn), jnp.float32)]

    out = pl.pallas_call(
        kernel,
        out_shape=jax.ShapeDtypeStruct((b_pad, n_pad2), out_dtype),
        grid_spec=pltpu.PrefetchScalarGridSpec(
            num_scalar_prefetch=0,
            grid=grid,
            in_specs=in_specs,
            out_specs=out_spec,
            scratch_shapes=scratch,
        ),
        compiler_params=pltpu.CompilerParams(
            dimension_semantics=("parallel", "parallel", "arbitrary"),
            vmem_limit_bytes=vmem_limit),
        cost_estimate=cost,
    )(x, wt, bias2d)

    return out[:B, :n_classes]


if __name__ == "__main__":
    # Small shapes consistent with LinearClassifier(in_dim, n_classes)
    B, in_dim, n_classes = 8, 32, 16

    key = jax.random.PRNGKey(0)
    kx, kw, kb = jax.random.split(key, 3)

    # Deterministic init mimicking nn.Linear's uniform(-1/sqrt(d), 1/sqrt(d))
    bound = 1.0 / (in_dim ** 0.5)
    weight = jax.random.uniform(kw, (n_classes, in_dim), jnp.float32, -bound, bound)
    bias = jax.random.uniform(kb, (n_classes,), jnp.float32, -bound, bound)
    x = jax.random.normal(kx, (B, in_dim), jnp.float32)

    ref = x @ weight.T + bias

    # f32 path (num_k == 1 fused kernel, resident weight)
    out = jax.block_until_ready(linear_classifier(x, weight, bias))
    assert out.shape == (B, n_classes)
    assert jnp.allclose(out, ref, atol=1e-5, rtol=1e-5)

    # bf16 MXU-operand path (x cast in-kernel, f32 accumulation)
    out_bf16 = jax.block_until_ready(
        linear_classifier(x, weight, bias, compute_dtype=jnp.bfloat16))
    assert out_bf16.shape == (B, n_classes)
    assert jnp.allclose(out_bf16, ref, atol=5e-2, rtol=5e-2)

    # Larger case: batch padding (divisor-aware, 2 batch tiles) + class padding
    B2, D2, C2 = 260, 256, 10
    kx2, kw2, kb2 = jax.random.split(jax.random.PRNGKey(1), 3)
    bound2 = 1.0 / (D2 ** 0.5)
    w2 = jax.random.uniform(kw2, (C2, D2), jnp.float32, -bound2, bound2)
    b2 = jax.random.uniform(kb2, (C2,), jnp.float32, -bound2, bound2)
    x2 = jax.random.normal(kx2, (B2, D2), jnp.float32)
    out2 = jax.block_until_ready(linear_classifier(x2, w2, b2))
    ref2 = jnp.dot(x2, w2.T, precision=lax.Precision.HIGHEST) + b2
    assert out2.shape == (B2, C2)
    assert jnp.allclose(out2, ref2, atol=1e-3, rtol=1e-3)

    # Force N- and K-tiling via a tiny VMEM budget to exercise the ksplit kernel
    B3, D3, C3 = 64, 512, 200
    kx3, kw3, kb3 = jax.random.split(jax.random.PRNGKey(2), 3)
    bound3 = 1.0 / (D3 ** 0.5)
    w3 = jax.random.uniform(kw3, (C3, D3), jnp.float32, -bound3, bound3)
    b3 = jax.random.uniform(kb3, (C3,), jnp.float32, -bound3, bound3)
    x3 = jax.random.normal(kx3, (B3, D3), jnp.float32)
    out3 = jax.block_until_ready(
        linear_classifier(x3, w3, b3, vmem_budget_bytes=256 * 1024))
    ref3 = jnp.dot(x3, w3.T, precision=lax.Precision.HIGHEST) + b3
    assert out3.shape == (B3, C3)
    assert jnp.allclose(out3, ref3, atol=2e-3, rtol=2e-3)

    print("KERNEL_OK")
</pallas_src>

<mosaic_0001>
module attributes {stable_mosaic.version = 11 : i64} {
  func.func @_linear_fused_kernel(%arg0: i32, %arg1: i32, %arg2: i32, %arg3: memref<8x32xf32, #tpu.memory_space<vmem>>, %arg4: memref<32x128xf32, #tpu.memory_space<vmem>>, %arg5: memref<1x128xf32, #tpu.memory_space<vmem>>, %arg6: memref<8x128xf32, #tpu.memory_space<vmem>>) attributes {dimension_semantics = [#tpu.dimension_semantics<parallel>, #tpu.dimension_semantics<parallel>, #tpu.dimension_semantics<arbitrary>], iteration_bounds = array<i64: 1, 1, 1>, scalar_prefetch = 0 : i64, scratch_operands = 0 : i64, tpu.core_type = #tpu.core_type<tc>, window_params = [{transform_indices = @transform_0, window_bounds = array<i64: 8, 32>}, {transform_indices = @transform_1, window_bounds = array<i64: 32, 128>}, {transform_indices = @transform_2, window_bounds = array<i64: 1, 128>}, {transform_indices = @transform_3, window_bounds = array<i64: 8, 128>}]} {
    %c0 = arith.constant 0 : index
    %c0_0 = arith.constant 0 : index
    %0 = vector.load %arg3[%c0, %c0_0] : memref<8x32xf32, #tpu.memory_space<vmem>>, vector<8x32xf32>
    %c0_1 = arith.constant 0 : index
    %c0_2 = arith.constant 0 : index
    %1 = vector.load %arg4[%c0_1, %c0_2] : memref<32x128xf32, #tpu.memory_space<vmem>>, vector<32x128xf32>
    %cst = arith.constant dense<0.000000e+00> : vector<8x128xf32>
    %2 = tpu.matmul %0, %1, %cst {dimension_numbers = #tpu.dot_dimension_numbers<[1], [0], [0], [1], [0, 0, 1, 1], [], []>} : vector<8x32xf32>, vector<32x128xf32>, vector<8x128xf32> -> vector<8x128xf32>
    %c0_3 = arith.constant 0 : index
    %c0_4 = arith.constant 0 : index
    %3 = vector.load %arg5[%c0_3, %c0_4] : memref<1x128xf32, #tpu.memory_space<vmem>>, vector<1x128xf32>
    %4 = vector.broadcast %3 : vector<1x128xf32> to vector<8x128xf32>
    %5 = arith.addf %2, %4 : vector<8x128xf32>
    %c0_5 = arith.constant 0 : index
    %c0_6 = arith.constant 0 : index
    %6 = vector.load %arg6[%c0_5, %c0_6] : memref<8x128xf32, #tpu.memory_space<vmem>>, vector<8x128xf32>
    tpu.vector_store %arg6[%c0_5, %c0_6], %5 {strides = array<i32>} : memref<8x128xf32, #tpu.memory_space<vmem>>, vector<8x128xf32>,
    return
  }
  func.func @transform_0(%arg0: i32, %arg1: i32, %arg2: i32) -> (i32, i32) {
    %c0_i32 = arith.constant 0 : i32
    return %arg0, %arg2 : i32, i32
  }
  func.func @transform_1(%arg0: i32, %arg1: i32, %arg2: i32) -> (i32, i32) {
    %c0_i32 = arith.constant 0 : i32
    return %arg2, %arg1 : i32, i32
  }
  func.func @transform_2(%arg0: i32, %arg1: i32, %arg2: i32) -> (i32, i32) {
    %c0_i32 = arith.constant 0 : i32
    %c0_i32_0 = arith.constant 0 : i32
    return %c0_i32, %arg1 : i32, i32
  }
  func.func @transform_3(%arg0: i32, %arg1: i32, %arg2: i32) -> (i32, i32) {
    %c0_i32 = arith.constant 0 : i32
    return %arg0, %arg1 : i32, i32
  }
}

</mosaic_0001>

<bundles_post_ra>
// kernel: tpu_custom_call.1
= control target key start
LH: loop header
LB: loop body
LE: loop exit
PB: predicated region body
PF: predicated region fallthrough
CT: control target
= control target key end

     0   :  { %8 = vsyncpa [#allocation3], 0  ;;  %s219_s0 = inlined_call_operand.hbm [shape: f32[8,32], index: 0, kind: input, shape index: {}]   ;;  %s220_s1 = inlined_call_operand.hbm [shape: f32[32,128], index: 1, kind: input, shape index: {}]   ;;  %s221_s2 = inlined_call_operand.vmem [shape: f32[1,128], index: 2, kind: input, shape index: {}]   ;;  %s222_s3 = inlined_call_operand.hbm [shape: f32[8,128], index: 3, kind: output, shape index: {}]  }
   0x1   :  { %9 = vsyncpa [#allocation6], 0 }
   0x2   :  { %10 = vsyncpa [#allocation4], 0  ;;  %s16_s14 = sshll.u32 %s219_s0, 4  ;;  %s182_s15 = smov [#allocation2]   ;;  %s17_s14 = int_to_ptr.hbm [resolvable:$true] %s16_s14 }
   0x3   :  { %s18_s16 = sshll.u32 %s182_s15, 4  ;;  %s26_s19 = sshll.u32 %s220_s1, 4  ;;  %s19_s16 = int_to_ptr.vmem [resolvable:$true] %s18_s16  ;;  %s27_s19 = int_to_ptr.hbm [resolvable:$true] %s26_s19 }
   0x4   :  { %21 = dma.hbm_to_vmem [thread:$0]  %s17_s14, 128, %s19_s16, [#allocation3]  }
   0x5   :  { %s183_s20 = smov [#allocation5]   ;;  %s184_s22 = smov 128  }
   0x6   :  { %s28_s21 = sshll.u32 %s183_s20, 4  ;;  %s185_s23 = smov 8   ;;  %s29_s21 = int_to_ptr.vmem [resolvable:$true] %s28_s21 }
   0x7   :  { %34 = dma.hbm_to_vmem [thread:$0]  %s27_s19, 512, %s29_s21, [#allocation6], %s184_s22, %s184_s22, %s185_s23  }
   0x8   :  { %176 = dma.done.wait [#allocation3], 128  }
   0x9   :  { %177 = vsyncadd [#allocation3], 4294967168 }
   0xa   :  { %178 = dma.done.wait [#allocation6], 512  }
   0xb   :  { %179 = vsyncadd [#allocation6], 4294966784  ;;  %v49_v0 = vld [vmem:[#allocation5 + $0x18] sm:$0xff]  ;;  %v48_v1 = vld [vmem:[#allocation5 + $0x10] sm:$0xff]  ;;  %vm54_vm0 = vcmask 261120   ;;  %s186_s24 = smov [#allocation7]  }
   0xc   :  { %70 = vmatpush.msra.mxu0 %v49_v0  ;;  %v47_v2 = vld [vmem:[#allocation5 + $0x8] sm:$0xff]  ;;  %v46_v3 = vld [vmem:[#allocation5] sm:$0xff]  ;;  %v45_v4 = vld [vmem:[#allocation2] sm:$0xff]  ;;  %s84_s25 = sshll.u32 %s186_s24, 4  ;;  %s86_s28 = sshll.u32 %s222_s3, 4  ;;  %s85_s25 = int_to_ptr.vmem [resolvable:$true] %s84_s25  ;;  %s87_s28 = int_to_ptr.hbm [resolvable:$true] %s86_s28 }
   0xd   :  { %v103_v5 = vld [vmem:[%s221_s2] ss:$0 sm:$0xff] }
   0xe   :  { %71 = vmatpush.msra.mxu0 %v48_v1 }
  0x10   :  { %72 = vmatpush.msra.mxu0 %v47_v2 }
  0x12   :  { %73 = vmatpush.msra.mxu0 %v46_v3 }
  0x13   :  { %97 = vmatmul.msk.f32.vlgmr.msra.gmra.mxu0 %vm54_vm0, %v45_v4 }
  0x90   :  { %v75_v6 = vpop.f32.mrf.mxu0 }
  0x91   :  { %v76_v7 = vadd.f32 %v103_v5, %v75_v6 }
  0x93   :  { %78 = vst [vmem:[#allocation7] sm:$0xff] %v76_v7 }
  0x94   :  { %89 = dma.vmem_to_hbm [thread:$0]  %s85_s25, 128, %s87_s28, [#allocation4]  }
  0x95   :  { %180 = dma.done.wait [#allocation4], 128  }
  0x96   :  { %181 = vsyncadd [#allocation4], 4294967168 }
  0x97   :  { %94 = vsyncpa [#allocation3], 1 }
  0x98   :  { %95 = vsyncpa [#allocation6], 1 }
  0x99   :  { %96 = vsyncpa [#allocation4], 1 }

</bundles_post_ra>
